<compile_context>
chip_gen: v7x
topology: tpu7x:2x2x1
jax: 0.10.0
libtpu: 0.0.40
codegen_flags: <defaults>
</compile_context>

<pallas_src>
import functools

import jax
import jax.numpy as jnp
from jax import lax
from jax.experimental import pallas as pl
from jax.experimental.pallas import tpu as pltpu


FRONTEND_FEAT = [64, 64, 'M', 128, 128, 'M', 256, 256, 256, 'M', 512, 512, 512]
BACKEND_FEAT = [512, 512, 512, 256, 128, 64]

VMEM_LIMIT_BYTES = 48 * 1024 * 1024   # safe on v7x (64 MiB/TC) and v5e/v6e (128 MiB)


def _pad_c(c):
    """Channel count padded up to a multiple of the 128-lane width."""
    return max(128, (c + 127) // 128 * 128)


def _largest_divisor_leq(total, cap):
    t = min(total, cap)
    while total % t != 0:
        t -= 1
    return t


# ---------------------------------------------------------------------------
# Fused Conv2d(stride=1, 'same', dilation d) + bias + ReLU.
#   grid = (batch, Cout_tiles, Cin_tiles)   (Cin = reduction axis, last)
#   x block : (Hp, Wp, tk)  bf16   (full padded spatial, one Cin tile)
#   w block : (kh*kw, tk, tn) bf16
#   b block : (1, tn)        f32
#   out     : (H, W, tn)     bf16
#   acc     : (H, W, tn)     f32 VMEM scratch, persists across the K axis
# ---------------------------------------------------------------------------
def _conv_kernel(x_ref, w_ref, b_ref, o_ref, acc_ref, *, kh, kw, d, H, W):
    kidx = pl.program_id(2)

    @pl.when(kidx == 0)
    def _init():
        acc_ref[...] = jnp.zeros_like(acc_ref)

    def row_body(y, carry):
        acc = acc_ref[y]                               # (W, tn) f32
        for t in range(kh * kw):                       # small static tap loop
            ky = t // kw
            kx = t % kw
            xs = x_ref[y + ky * d, pl.ds(kx * d, W), :]   # (W, tk) bf16
            acc = acc + jnp.dot(xs, w_ref[t],
                                preferred_element_type=jnp.float32)
        acc_ref[y] = acc
        return carry

    lax.fori_loop(0, H, row_body, 0)

    @pl.when(kidx == pl.num_programs(2) - 1)
    def _epilogue():
        res = acc_ref[...] + b_ref[...]                # (H,W,tn) + (1,tn), f32
        o_ref[...] = jnp.maximum(res, 0.0).astype(o_ref.dtype)


def conv2d_bias_relu(x, w_packed, b_packed, dilation=1):
    """x: (N,H,W,Cinp) bf16, w_packed: (kh*kw,Cinp,Coutp) bf16, b_packed: (1,Coutp) f32."""
    n, h, wd, cinp = x.shape
    khkw, cinp_w, coutp = w_packed.shape
    assert cinp == cinp_w, (cinp, cinp_w)
    kh = kw = 3 if khkw == 9 else 1
    pad = dilation * (kh - 1) // 2
    if pad:
        xp = jnp.pad(x, ((0, 0), (pad, pad), (pad, pad), (0, 0)))
    else:
        xp = x
    hp, wpad = h + 2 * pad, wd + 2 * pad

    tk = min(cinp, 256)     # Cin tile (reduction axis)
    tn = min(coutp, 256)    # Cout tile (lane-dense, multiple of 128 unless Coutp==1)
    grid = (n, coutp // tn, cinp // tk)

    kernel = functools.partial(_conv_kernel, kh=kh, kw=kw, d=dilation, H=h, W=wd)
    out = pl.pallas_call(
        kernel,
        out_shape=jax.ShapeDtypeStruct((n, h, wd, coutp), jnp.bfloat16),
        grid=grid,
        in_specs=[
            pl.BlockSpec((None, hp, wpad, tk), lambda b, j, k: (b, 0, 0, k)),
            pl.BlockSpec((khkw, tk, tn), lambda b, j, k: (0, k, j)),
            pl.BlockSpec((1, tn), lambda b, j, k: (0, j)),
        ],
        out_specs=pl.BlockSpec((None, h, wd, tn), lambda b, j, k: (b, 0, 0, j)),
        scratch_shapes=[pltpu.VMEM((h, wd, tn), jnp.float32)],
        compiler_params=pltpu.CompilerParams(
            dimension_semantics=("parallel", "parallel", "arbitrary"),
            vmem_limit_bytes=VMEM_LIMIT_BYTES),
    )(xp, w_packed, b_packed)
    return out


# ---------------------------------------------------------------------------
# MaxPool2d(kernel=2, stride=2): single reshaped input, row-tiled kernel.
# ---------------------------------------------------------------------------
def _maxpool_kernel(x_ref, o_ref):
    v = x_ref[...]                                   # (tr, 2, wo, 2, c)
    o_ref[...] = jnp.maximum(
        jnp.maximum(v[:, 0, :, 0, :], v[:, 0, :, 1, :]),
        jnp.maximum(v[:, 1, :, 0, :], v[:, 1, :, 1, :]))


def maxpool2x2(x):
    n, h, w, c = x.shape
    ho, wo = h // 2, w // 2                          # floor, like PyTorch
    xr = x[:, :2 * ho, :2 * wo, :].reshape(n * ho, 2, wo, 2, c)   # free reshape
    rows = n * ho
    tr = _largest_divisor_leq(rows, 256)
    out = pl.pallas_call(
        _maxpool_kernel,
        out_shape=jax.ShapeDtypeStruct((rows, wo, c), x.dtype),
        grid=(rows // tr,),
        in_specs=[pl.BlockSpec((tr, 2, wo, 2, c), lambda i: (i, 0, 0, 0, 0))],
        out_specs=pl.BlockSpec((tr, wo, c), lambda i: (i, 0, 0)),
        compiler_params=pltpu.CompilerParams(
            dimension_semantics=("parallel",),
            vmem_limit_bytes=VMEM_LIMIT_BYTES),
    )(xr)
    return out.reshape(n, ho, wo, c)


# ---------------------------------------------------------------------------
# Deterministic synthetic params, packed & padded once at init.
#   weight -> (kh*kw, Cinp, Coutp) bf16 ; bias -> (1, Coutp) f32
# Padded input channels / output channels carry zeros through every layer.
# ---------------------------------------------------------------------------
def _pack_conv(key, kh, kw, cin, cout, coutp=None):
    cinp = _pad_c(cin)
    if coutp is None:
        coutp = _pad_c(cout)
    wkey, bkey = jax.random.split(key)
    fan_in = kh * kw * cin
    w = jax.random.normal(wkey, (kh, kw, cin, cout), jnp.float32) * (2.0 / fan_in) ** 0.5
    b = 0.01 * jax.random.normal(bkey, (cout,), jnp.float32)
    wp = jnp.zeros((kh * kw, cinp, coutp), jnp.float32)
    wp = wp.at[:, :cin, :cout].set(w.reshape(kh * kw, cin, cout))
    bp = jnp.zeros((1, coutp), jnp.float32).at[0, :cout].set(b)
    return wp.astype(jnp.bfloat16), bp


def init_cnet_params(key):
    params = {'frontend': [], 'backend': [], 'output': None}
    cin = 3
    for v in FRONTEND_FEAT:
        if v == 'M':
            continue
        key, sub = jax.random.split(key)
        params['frontend'].append(_pack_conv(sub, 3, 3, cin, v))
        cin = v
    cin = 512
    for v in BACKEND_FEAT:
        key, sub = jax.random.split(key)
        params['backend'].append(_pack_conv(sub, 3, 3, cin, v))
        cin = v
    key, sub = jax.random.split(key)
    params['output'] = _pack_conv(sub, 1, 1, 64, 1, coutp=1)   # head: Cout=1, not lane-padded
    return params


# ---------------------------------------------------------------------------
# CNet forward pass (NCHW in / NCHW out, like the PyTorch module)
# ---------------------------------------------------------------------------
def cnet_forward(params, x_nchw):
    x = jnp.transpose(x_nchw, (0, 2, 3, 1)).astype(jnp.bfloat16)    # NCHW -> NHWC bf16
    c = x.shape[-1]
    x = jnp.pad(x, ((0, 0), (0, 0), (0, 0), (0, _pad_c(c) - c)))    # pad channels once
    conv_iter = iter(params['frontend'])
    for v in FRONTEND_FEAT:
        if v == 'M':
            x = maxpool2x2(x)
        else:
            w, b = next(conv_iter)
            x = conv2d_bias_relu(x, w, b, dilation=1)
    for (w, b) in params['backend']:
        x = conv2d_bias_relu(x, w, b, dilation=2)
    # F.relu(backend(x)): backend already ends in ReLU -> extra ReLU is identity.
    w, b = params['output']
    x = conv2d_bias_relu(x, w, b, dilation=1)                       # 1x1 conv + ReLU, Cout=1
    return jnp.transpose(x.astype(jnp.float32), (0, 3, 1, 2))       # NHWC -> NCHW


# ---------------------------------------------------------------------------
# Cheap numeric self-checks against plain-JAX references (tolerant of bf16 output).
# ---------------------------------------------------------------------------
def _check_conv():
    k1, k2, k3 = jax.random.split(jax.random.PRNGKey(42), 3)
    cin, cout, hh, ww, d = 512, 128, 8, 8, 2          # exercises the Cin(K)-tiled accumulator
    x = jax.random.normal(k1, (1, hh, ww, cin), jnp.float32)
    w = jax.random.normal(k2, (3, 3, cin, cout), jnp.float32) * (2.0 / (9 * cin)) ** 0.5
    b = 0.01 * jax.random.normal(k3, (cout,), jnp.float32)
    xb = x.astype(jnp.bfloat16)
    wb = w.astype(jnp.bfloat16)
    got = conv2d_bias_relu(xb, wb.reshape(9, cin, cout), b.reshape(1, cout),
                           dilation=d).astype(jnp.float32)
    ref = lax.conv_general_dilated(
        xb.astype(jnp.float32), wb.astype(jnp.float32),
        window_strides=(1, 1), padding="SAME", rhs_dilation=(d, d),
        dimension_numbers=("NHWC", "HWIO", "NHWC"))
    ref = jnp.maximum(ref + b, 0.0)
    err = float(jnp.max(jnp.abs(got - ref)))
    assert err < 0.1, err


def _check_pool():
    x = jax.random.normal(jax.random.PRNGKey(7), (2, 8, 8, 128),
                          jnp.float32).astype(jnp.bfloat16)
    got = maxpool2x2(x)
    ref = x.reshape(2, 4, 2, 4, 2, 128).max(axis=(2, 4))
    assert bool(jnp.array_equal(got, ref))


if __name__ == "__main__":
    _check_conv()
    _check_pool()

    key = jax.random.PRNGKey(0)
    pkey, xkey = jax.random.split(key)
    params = init_cnet_params(pkey)
    x = jax.random.normal(xkey, (2, 3, 16, 16), jnp.float32)    # NCHW like PyTorch
    out = jax.jit(cnet_forward)(params, x)
    out = jax.block_until_ready(out)
    assert out.shape == (2, 1, 2, 2), out.shape                 # 3 maxpools: 16 -> 2
    assert bool(jnp.all(out >= 0.0))                            # final ReLU
    print("KERNEL_OK")
</pallas_src>

<mosaic_0001>
module attributes {stable_mosaic.version = 11 : i64} {
  func.func @_conv_kernel(%arg0: i32, %arg1: i32, %arg2: i32, %arg3: memref<1x12x12x256xbf16, #tpu.memory_space<vmem>>, %arg4: memref<9x256x128xbf16, #tpu.memory_space<vmem>>, %arg5: memref<1x128xf32, #tpu.memory_space<vmem>>, %arg6: memref<1x8x8x128xbf16, #tpu.memory_space<vmem>>, %arg7: memref<8x8x128xf32, #tpu.memory_space<vmem>>) attributes {dimension_semantics = [#tpu.dimension_semantics<parallel>, #tpu.dimension_semantics<parallel>, #tpu.dimension_semantics<arbitrary>], iteration_bounds = array<i64: 1, 1, 2>, scalar_prefetch = 0 : i64, scratch_operands = 1 : i64, tpu.core_type = #tpu.core_type<tc>, window_params = [{transform_indices = @transform_0, window_bounds = array<i64: 1, 12, 12, 256>}, {transform_indices = @transform_1, window_bounds = array<i64: 9, 256, 128>}, {transform_indices = @transform_2, window_bounds = array<i64: 1, 128>}, {transform_indices = @transform_3, window_bounds = array<i64: 1, 8, 8, 128>}]} {
    %c0_i32 = arith.constant 0 : i32
    %0 = arith.cmpi eq, %arg2, %c0_i32 : i32
    %1 = arith.extui %0 : i1 to i32
    %c0_i32_0 = arith.constant 0 : i32
    %2 = arith.cmpi ne, %1, %c0_i32_0 : i32
    scf.if %2 {
      %cst = arith.constant 0.000000e+00 : f32
      %7 = vector.broadcast %cst : f32 to vector<8x8x128xf32>
      %c0 = arith.constant 0 : index
      %c0_5 = arith.constant 0 : index
      %c0_6 = arith.constant 0 : index
      %8 = vector.load %arg7[%c0, %c0_5, %c0_6] : memref<8x8x128xf32, #tpu.memory_space<vmem>>, vector<8x8x128xf32>
      tpu.vector_store %arg7[%c0, %c0_5, %c0_6], %7 {strides = array<i32>} : memref<8x8x128xf32, #tpu.memory_space<vmem>>, vector<8x8x128xf32>,
    } else {
    }
    %c0_i32_1 = arith.constant 0 : i32
    %c8_i32 = arith.constant 8 : i32
    %3 = arith.addi %c0_i32_1, %c8_i32 : i32
    %c1_i32 = arith.constant 1 : i32
    scf.for %arg8 = %c0_i32_1 to %3 step %c1_i32  : i32 {
      %7 = arith.index_cast %arg8 : i32 to index
      %c0 = arith.constant 0 : index
      %c0_5 = arith.constant 0 : index
      %8 = vector.load %arg7[%7, %c0, %c0_5] : memref<8x8x128xf32, #tpu.memory_space<vmem>>, vector<1x8x128xf32>
      %9 = vector.shape_cast %8 : vector<1x8x128xf32> to vector<8x128xf32>
      %c0_i32_6 = arith.constant 0 : i32
      %10 = arith.addi %arg8, %c0_i32_6 : i32
      %c0_7 = arith.constant 0 : index
      %11 = arith.index_cast %10 : i32 to index
      %c0_8 = arith.constant 0 : index
      %c0_9 = arith.constant 0 : index
      %12 = vector.load %arg3[%c0_7, %11, %c0_8, %c0_9] : memref<1x12x12x256xbf16, #tpu.memory_space<vmem>>, vector<1x1x8x256xbf16>
      %13 = vector.shape_cast %12 : vector<1x1x8x256xbf16> to vector<8x256xbf16>
      %c0_10 = arith.constant 0 : index
      %c0_11 = arith.constant 0 : index
      %c0_12 = arith.constant 0 : index
      %14 = vector.load %arg4[%c0_10, %c0_11, %c0_12] : memref<9x256x128xbf16, #tpu.memory_space<vmem>>, vector<1x256x128xbf16>
      %15 = vector.shape_cast %14 : vector<1x256x128xbf16> to vector<256x128xbf16>
      %cst = arith.constant dense<0.000000e+00> : vector<8x128xf32>
      %16 = tpu.matmul %13, %15, %cst {dimension_numbers = #tpu.dot_dimension_numbers<[1], [0], [0], [1], [0, 0, 1, 1], [], []>} : vector<8x256xbf16>, vector<256x128xbf16>, vector<8x128xf32> -> vector<8x128xf32>
      %17 = arith.addf %9, %16 : vector<8x128xf32>
      %c0_i32_13 = arith.constant 0 : i32
      %18 = arith.addi %arg8, %c0_i32_13 : i32
      %c0_14 = arith.constant 0 : index
      %19 = arith.index_cast %18 : i32 to index
      %c2 = arith.constant 2 : index
      %c0_15 = arith.constant 0 : index
      %20 = vector.load %arg3[%c0_14, %19, %c2, %c0_15] : memref<1x12x12x256xbf16, #tpu.memory_space<vmem>>, vector<1x1x8x256xbf16>
      %21 = vector.shape_cast %20 : vector<1x1x8x256xbf16> to vector<8x256xbf16>
      %c1 = arith.constant 1 : index
      %c0_16 = arith.constant 0 : index
      %c0_17 = arith.constant 0 : index
      %22 = vector.load %arg4[%c1, %c0_16, %c0_17] : memref<9x256x128xbf16, #tpu.memory_space<vmem>>, vector<1x256x128xbf16>
      %23 = vector.shape_cast %22 : vector<1x256x128xbf16> to vector<256x128xbf16>
      %cst_18 = arith.constant dense<0.000000e+00> : vector<8x128xf32>
      %24 = tpu.matmul %21, %23, %cst_18 {dimension_numbers = #tpu.dot_dimension_numbers<[1], [0], [0], [1], [0, 0, 1, 1], [], []>} : vector<8x256xbf16>, vector<256x128xbf16>, vector<8x128xf32> -> vector<8x128xf32>
      %25 = arith.addf %17, %24 : vector<8x128xf32>
      %c0_i32_19 = arith.constant 0 : i32
      %26 = arith.addi %arg8, %c0_i32_19 : i32
      %c0_20 = arith.constant 0 : index
      %27 = arith.index_cast %26 : i32 to index
      %c4 = arith.constant 4 : index
      %c0_21 = arith.constant 0 : index
      %28 = vector.load %arg3[%c0_20, %27, %c4, %c0_21] : memref<1x12x12x256xbf16, #tpu.memory_space<vmem>>, vector<1x1x8x256xbf16>
      %29 = vector.shape_cast %28 : vector<1x1x8x256xbf16> to vector<8x256xbf16>
      %c2_22 = arith.constant 2 : index
      %c0_23 = arith.constant 0 : index
      %c0_24 = arith.constant 0 : index
      %30 = vector.load %arg4[%c2_22, %c0_23, %c0_24] : memref<9x256x128xbf16, #tpu.memory_space<vmem>>, vector<1x256x128xbf16>
      %31 = vector.shape_cast %30 : vector<1x256x128xbf16> to vector<256x128xbf16>
      %cst_25 = arith.constant dense<0.000000e+00> : vector<8x128xf32>
      %32 = tpu.matmul %29, %31, %cst_25 {dimension_numbers = #tpu.dot_dimension_numbers<[1], [0], [0], [1], [0, 0, 1, 1], [], []>} : vector<8x256xbf16>, vector<256x128xbf16>, vector<8x128xf32> -> vector<8x128xf32>
      %33 = arith.addf %25, %32 : vector<8x128xf32>
      %c2_i32 = arith.constant 2 : i32
      %34 = arith.addi %arg8, %c2_i32 : i32
      %c0_26 = arith.constant 0 : index
      %35 = arith.index_cast %34 : i32 to index
      %c0_27 = arith.constant 0 : index
      %c0_28 = arith.constant 0 : index
      %36 = vector.load %arg3[%c0_26, %35, %c0_27, %c0_28] : memref<1x12x12x256xbf16, #tpu.memory_space<vmem>>, vector<1x1x8x256xbf16>
      %37 = vector.shape_cast %36 : vector<1x1x8x256xbf16> to vector<8x256xbf16>
      %c3 = arith.constant 3 : index
      %c0_29 = arith.constant 0 : index
      %c0_30 = arith.constant 0 : index
      %38 = vector.load %arg4[%c3, %c0_29, %c0_30] : memref<9x256x128xbf16, #tpu.memory_space<vmem>>, vector<1x256x128xbf16>
      %39 = vector.shape_cast %38 : vector<1x256x128xbf16> to vector<256x128xbf16>
      %cst_31 = arith.constant dense<0.000000e+00> : vector<8x128xf32>
      %40 = tpu.matmul %37, %39, %cst_31 {dimension_numbers = #tpu.dot_dimension_numbers<[1], [0], [0], [1], [0, 0, 1, 1], [], []>} : vector<8x256xbf16>, vector<256x128xbf16>, vector<8x128xf32> -> vector<8x128xf32>
      %41 = arith.addf %33, %40 : vector<8x128xf32>
      %c2_i32_32 = arith.constant 2 : i32
      %42 = arith.addi %arg8, %c2_i32_32 : i32
      %c0_33 = arith.constant 0 : index
      %43 = arith.index_cast %42 : i32 to index
      %c2_34 = arith.constant 2 : index
      %c0_35 = arith.constant 0 : index
      %44 = vector.load %arg3[%c0_33, %43, %c2_34, %c0_35] : memref<1x12x12x256xbf16, #tpu.memory_space<vmem>>, vector<1x1x8x256xbf16>
      %45 = vector.shape_cast %44 : vector<1x1x8x256xbf16> to vector<8x256xbf16>
      %c4_36 = arith.constant 4 : index
      %c0_37 = arith.constant 0 : index
      %c0_38 = arith.constant 0 : index
      %46 = vector.load %arg4[%c4_36, %c0_37, %c0_38] : memref<9x256x128xbf16, #tpu.memory_space<vmem>>, vector<1x256x128xbf16>
      %47 = vector.shape_cast %46 : vector<1x256x128xbf16> to vector<256x128xbf16>
      %cst_39 = arith.constant dense<0.000000e+00> : vector<8x128xf32>
      %48 = tpu.matmul %45, %47, %cst_39 {dimension_numbers = #tpu.dot_dimension_numbers<[1], [0], [0], [1], [0, 0, 1, 1], [], []>} : vector<8x256xbf16>, vector<256x128xbf16>, vector<8x128xf32> -> vector<8x128xf32>
      %49 = arith.addf %41, %48 : vector<8x128xf32>
      %c2_i32_40 = arith.constant 2 : i32
      %50 = arith.addi %arg8, %c2_i32_40 : i32
      %c0_41 = arith.constant 0 : index
      %51 = arith.index_cast %50 : i32 to index
      %c4_42 = arith.constant 4 : index
      %c0_43 = arith.constant 0 : index
      %52 = vector.load %arg3[%c0_41, %51, %c4_42, %c0_43] : memref<1x12x12x256xbf16, #tpu.memory_space<vmem>>, vector<1x1x8x256xbf16>
      %53 = vector.shape_cast %52 : vector<1x1x8x256xbf16> to vector<8x256xbf16>
      %c5 = arith.constant 5 : index
      %c0_44 = arith.constant 0 : index
      %c0_45 = arith.constant 0 : index
      %54 = vector.load %arg4[%c5, %c0_44, %c0_45] : memref<9x256x128xbf16, #tpu.memory_space<vmem>>, vector<1x256x128xbf16>
      %55 = vector.shape_cast %54 : vector<1x256x128xbf16> to vector<256x128xbf16>
      %cst_46 = arith.constant dense<0.000000e+00> : vector<8x128xf32>
      %56 = tpu.matmul %53, %55, %cst_46 {dimension_numbers = #tpu.dot_dimension_numbers<[1], [0], [0], [1], [0, 0, 1, 1], [], []>} : vector<8x256xbf16>, vector<256x128xbf16>, vector<8x128xf32> -> vector<8x128xf32>
      %57 = arith.addf %49, %56 : vector<8x128xf32>
      %c4_i32 = arith.constant 4 : i32
      %58 = arith.addi %arg8, %c4_i32 : i32
      %c0_47 = arith.constant 0 : index
      %59 = arith.index_cast %58 : i32 to index
      %c0_48 = arith.constant 0 : index
      %c0_49 = arith.constant 0 : index
      %60 = vector.load %arg3[%c0_47, %59, %c0_48, %c0_49] : memref<1x12x12x256xbf16, #tpu.memory_space<vmem>>, vector<1x1x8x256xbf16>
      %61 = vector.shape_cast %60 : vector<1x1x8x256xbf16> to vector<8x256xbf16>
      %c6 = arith.constant 6 : index
      %c0_50 = arith.constant 0 : index
      %c0_51 = arith.constant 0 : index
      %62 = vector.load %arg4[%c6, %c0_50, %c0_51] : memref<9x256x128xbf16, #tpu.memory_space<vmem>>, vector<1x256x128xbf16>
      %63 = vector.shape_cast %62 : vector<1x256x128xbf16> to vector<256x128xbf16>
      %cst_52 = arith.constant dense<0.000000e+00> : vector<8x128xf32>
      %64 = tpu.matmul %61, %63, %cst_52 {dimension_numbers = #tpu.dot_dimension_numbers<[1], [0], [0], [1], [0, 0, 1, 1], [], []>} : vector<8x256xbf16>, vector<256x128xbf16>, vector<8x128xf32> -> vector<8x128xf32>
      %65 = arith.addf %57, %64 : vector<8x128xf32>
      %c4_i32_53 = arith.constant 4 : i32
      %66 = arith.addi %arg8, %c4_i32_53 : i32
      %c0_54 = arith.constant 0 : index
      %67 = arith.index_cast %66 : i32 to index
      %c2_55 = arith.constant 2 : index
      %c0_56 = arith.constant 0 : index
      %68 = vector.load %arg3[%c0_54, %67, %c2_55, %c0_56] : memref<1x12x12x256xbf16, #tpu.memory_space<vmem>>, vector<1x1x8x256xbf16>
      %69 = vector.shape_cast %68 : vector<1x1x8x256xbf16> to vector<8x256xbf16>
      %c7 = arith.constant 7 : index
      %c0_57 = arith.constant 0 : index
      %c0_58 = arith.constant 0 : index
      %70 = vector.load %arg4[%c7, %c0_57, %c0_58] : memref<9x256x128xbf16, #tpu.memory_space<vmem>>, vector<1x256x128xbf16>
      %71 = vector.shape_cast %70 : vector<1x256x128xbf16> to vector<256x128xbf16>
      %cst_59 = arith.constant dense<0.000000e+00> : vector<8x128xf32>
      %72 = tpu.matmul %69, %71, %cst_59 {dimension_numbers = #tpu.dot_dimension_numbers<[1], [0], [0], [1], [0, 0, 1, 1], [], []>} : vector<8x256xbf16>, vector<256x128xbf16>, vector<8x128xf32> -> vector<8x128xf32>
      %73 = arith.addf %65, %72 : vector<8x128xf32>
      %c4_i32_60 = arith.constant 4 : i32
      %74 = arith.addi %arg8, %c4_i32_60 : i32
      %c0_61 = arith.constant 0 : index
      %75 = arith.index_cast %74 : i32 to index
      %c4_62 = arith.constant 4 : index
      %c0_63 = arith.constant 0 : index
      %76 = vector.load %arg3[%c0_61, %75, %c4_62, %c0_63] : memref<1x12x12x256xbf16, #tpu.memory_space<vmem>>, vector<1x1x8x256xbf16>
      %77 = vector.shape_cast %76 : vector<1x1x8x256xbf16> to vector<8x256xbf16>
      %c8 = arith.constant 8 : index
      %c0_64 = arith.constant 0 : index
      %c0_65 = arith.constant 0 : index
      %78 = vector.load %arg4[%c8, %c0_64, %c0_65] : memref<9x256x128xbf16, #tpu.memory_space<vmem>>, vector<1x256x128xbf16>
      %79 = vector.shape_cast %78 : vector<1x256x128xbf16> to vector<256x128xbf16>
      %cst_66 = arith.constant dense<0.000000e+00> : vector<8x128xf32>
      %80 = tpu.matmul %77, %79, %cst_66 {dimension_numbers = #tpu.dot_dimension_numbers<[1], [0], [0], [1], [0, 0, 1, 1], [], []>} : vector<8x256xbf16>, vector<256x128xbf16>, vector<8x128xf32> -> vector<8x128xf32>
      %81 = arith.addf %73, %80 : vector<8x128xf32>
      %82 = arith.index_cast %arg8 : i32 to index
      %c0_67 = arith.constant 0 : index
      %c0_68 = arith.constant 0 : index
      %83 = vector.load %arg7[%82, %c0_67, %c0_68] : memref<8x8x128xf32, #tpu.memory_space<vmem>>, vector<1x8x128xf32>
      %84 = vector.shape_cast %83 : vector<1x8x128xf32> to vector<8x128xf32>
      %85 = vector.shape_cast %81 : vector<8x128xf32> to vector<1x8x128xf32>
      tpu.vector_store %arg7[%82, %c0_67, %c0_68], %85 {strides = array<i32>} : memref<8x8x128xf32, #tpu.memory_space<vmem>>, vector<1x8x128xf32>,
    }
    %c8_i32_2 = arith.constant 8 : i32
    %c1_i32_3 = arith.constant 1 : i32
    %4 = arith.cmpi eq, %arg2, %c1_i32_3 : i32
    %5 = arith.extui %4 : i1 to i32
    %c0_i32_4 = arith.constant 0 : i32
    %6 = arith.cmpi ne, %5, %c0_i32_4 : i32
    scf.if %6 {
      %c0 = arith.constant 0 : index
      %c0_5 = arith.constant 0 : index
      %c0_6 = arith.constant 0 : index
      %7 = vector.load %arg7[%c0, %c0_5, %c0_6] : memref<8x8x128xf32, #tpu.memory_space<vmem>>, vector<8x8x128xf32>
      %c0_7 = arith.constant 0 : index
      %c0_8 = arith.constant 0 : index
      %8 = vector.load %arg5[%c0_7, %c0_8] : memref<1x128xf32, #tpu.memory_space<vmem>>, vector<1x128xf32>
      %9 = vector.shape_cast %8 : vector<1x128xf32> to vector<1x1x128xf32>
      %10 = vector.broadcast %9 : vector<1x1x128xf32> to vector<8x8x128xf32>
      %11 = arith.addf %7, %10 : vector<8x8x128xf32>
      %cst = arith.constant 0.000000e+00 : f32
      %12 = vector.broadcast %cst : f32 to vector<8x8x128xf32>
      %13 = arith.maximumf %11, %12 : vector<8x8x128xf32>
      %14 = arith.truncf %13 : vector<8x8x128xf32> to vector<8x8x128xbf16>
      %c0_9 = arith.constant 0 : index
      %c0_10 = arith.constant 0 : index
      %c0_11 = arith.constant 0 : index
      %c0_12 = arith.constant 0 : index
      %15 = vector.load %arg6[%c0_9, %c0_10, %c0_11, %c0_12] : memref<1x8x8x128xbf16, #tpu.memory_space<vmem>>, vector<1x8x8x128xbf16>
      %16 = vector.shape_cast %15 : vector<1x8x8x128xbf16> to vector<8x8x128xbf16>
      %17 = vector.shape_cast %14 : vector<8x8x128xbf16> to vector<1x8x8x128xbf16>
      tpu.vector_store %arg6[%c0_9, %c0_10, %c0_11, %c0_12], %17 {strides = array<i32>} : memref<1x8x8x128xbf16, #tpu.memory_space<vmem>>, vector<1x8x8x128xbf16>,
    } else {
    }
    return
  }
  func.func @transform_0(%arg0: i32, %arg1: i32, %arg2: i32) -> (i32, i32, i32, i32) {
    %c0_i32 = arith.constant 0 : i32
    %c0_i32_0 = arith.constant 0 : i32
    %c0_i32_1 = arith.constant 0 : i32
    return %arg0, %c0_i32, %c0_i32_0, %arg2 : i32, i32, i32, i32
  }
  func.func @transform_1(%arg0: i32, %arg1: i32, %arg2: i32) -> (i32, i32, i32) {
    %c0_i32 = arith.constant 0 : i32
    %c0_i32_0 = arith.constant 0 : i32
    return %c0_i32, %arg2, %arg1 : i32, i32, i32
  }
  func.func @transform_2(%arg0: i32, %arg1: i32, %arg2: i32) -> (i32, i32) {
    %c0_i32 = arith.constant 0 : i32
    %c0_i32_0 = arith.constant 0 : i32
    return %c0_i32, %arg1 : i32, i32
  }
  func.func @transform_3(%arg0: i32, %arg1: i32, %arg2: i32) -> (i32, i32, i32, i32) {
    %c0_i32 = arith.constant 0 : i32
    %c0_i32_0 = arith.constant 0 : i32
    %c0_i32_1 = arith.constant 0 : i32
    return %arg0, %c0_i32, %c0_i32_0, %arg1 : i32, i32, i32, i32
  }
}

</mosaic_0001>

<bundles_post_ra>
// kernel: tpu_custom_call.1
= control target key start
LH: loop header
LB: loop body
LE: loop exit
PB: predicated region body
PF: predicated region fallthrough
CT: control target
= control target key end

     0   :  { %8 = vsyncpa [#allocation4], 0  ;;  %s3668_s0 = inlined_call_operand.hbm [shape: bf16[1,12,12,512], index: 0, kind: input, shape index: {}]   ;;  %s3669_s1 = inlined_call_operand.hbm [shape: bf16[9,512,128], index: 1, kind: input, shape index: {}]   ;;  %s3670_s2 = inlined_call_operand.hbm [shape: f32[1,128], index: 2, kind: input, shape index: {}]   ;;  %s3671_s3 = inlined_call_operand.hbm [shape: bf16[1,8,8,128], index: 3, kind: output, shape index: {}]  }
   0x1   :  { %10 = vsyncpa [#allocation4 + $0x1], 0 }
   0x2   :  { %11 = vsyncpa [#allocation7], 0 }
   0x3   :  { %13 = vsyncpa [#allocation7 + $0x1], 0 }
   0x4   :  { %14 = vsyncpa [#allocation5], 0  ;;  %s3285_s12 = smov 0   ;;  %s3287_s13 = smov 0  }
   0x5   :  { %s3289_s14 = smov 0   ;;  %s3291_s15 = smov 0  }
   0x6   :  { %s3293_s16 = smov 0   ;;  %s3295_s17 = smov 0  }
   0x7 LB: > { %s3314_s18 = sadd.s32 4294967295, %s3244_s17   ;;  %s32_s19 = sadd.s32 1, %s3240_s16  ;;  %s3244_s17 = sphi %s3295_s17, %s20_s17   ;;  %s3240_s16 = sphi %s3293_s16, %s3689_s16   ;;  %s3236_s15 = sphi %s3291_s15, %s3688_s15   ;;  %s3232_s14 = sphi %s3289_s14, %s3687_s14   ;;  %s3228_s13 = sphi %s3287_s13, %s3686_s13   ;;  %s3224_s12 = sphi %s3285_s12, %s3685_s12  }
   0x8   : > { %p33_p0 = scmp.ge.s32.totalorder %s32_s19, 2  ;;  %s48_s20 = sadd.s32 1, %s3232_s14 }
   0x9   : > { %p55_p1 = scmp.ne.s32.totalorder %s3232_s14, %s3228_s13  ;;  %p56_p2 = scmp.eq.s32.totalorder %s3244_s17, 0 }
   0xa   : > { %s3691_s19 = smov (%p33_p0, %s32_s19), 0  ;;  %p61_p4 = scmp.ne.s32.totalorder %s3228_s13, %s3224_s12 }
   0xb   : > { %p3323_p3 = por %p56_p2, %p55_p1  ;;  %s44_s22 = ssub.s32 %s3240_s16, %s3691_s19 }
   0xc   : > { %p3672_p5 = scmp.eq.s32.totalorder %s3314_s18, 0  ;;  %p46_p6 = scmp.eq.s32.totalorder %s44_s22, 0 }
   0xd   : > { %s3676_s21 = scalar_select %p3323_p3, 1, 0 }
   0xe   : > { %p2152_p7 = scmp.ge.s32.totalorder %s3244_s17, 1  ;;  %p3334_p8 = por %p3672_p5, %p61_p4 }
   0xf   : > { %p154_p9 = scmp.lt.s32.totalorder %s3244_s17, 3  ;;  %s3250_s26 = smov [#allocation8]  }
  0x10   : > { %s3677_s23 = scalar_select %p3334_p8, 1, 0 }
  0x11   : > { %s3340_s24 = scalar_select %p46_p6, %s3232_s14, %s48_s20  }
  0x12   : > { %p3342_p10 = pnand %p2152_p7, %p154_p9  ;;  %s169_s27 = sshll.u32 %s3250_s26, 4  ;;  %s170_s27 = int_to_ptr.vmem [resolvable:$true] %s169_s27 }
  0x13   : > { %s3096_s4 = scalar_lea.hbm %s3670_s2, 16 }
  0x14   : > { %s3678_s25 = scalar_select %p3342_p10, 1, 0 }
  0x15   : > { %p2850_p11 = pneg %p3342_p10  ;;  %p3097_p13 = scmp.ne.s32.totalorder %s3670_s2, %s3096_s4 }
  0x16   : > { %p3103_p4 = scmp.lt.u32.totalorder %s3096_s4, %s3670_s2 }
  0x17   : > { %p3350_p12 = pnand %p2850_p11, %p3672_p5 }
  0x19   : > { %p3098_p0 = pneg %p3350_p12 }
  0x1b   : > { %p3099_p1 = pnand %p3098_p0, %p3097_p13 }
  0x1d   : > { %p3100_p2 = pneg %p3099_p1 }
  0x1f   : > { %p3105_p6 = pnand %p3103_p4, %p3100_p2 }
  0x21   : > { %3108 = shalt.err (!%p3105_p6)
}
  0x22   : > { %s3109_s9 = scalar_lea.vmem %s170_s27, 16  ;;  %s3116_s10 = scalar_lea.vmem %s170_s27, 32 }
  0x23   : > { %p3110_p7 = scmp.ne.s32.totalorder %s170_s27, %s3109_s9  ;;  %p3117_p5 = scmp.lt.s32.totalorder %s170_s27, %s170_s27 }
  0x24   : > { %p3118_p8 = scmp.lt.s32.totalorder %s3116_s10, %s3109_s9 }
  0x25   : > { %p3112_p9 = pnand %p3110_p7, %p3098_p0 }
  0x26   : > { %p3119_p10 = por %p3118_p8, %p3117_p5 }
  0x27   : > { %p3113_p11 = pneg %p3112_p9 }
  0x29   : > { %p3120_p3 = pnand %p3119_p10, %p3113_p11 }
  0x2b   : > { %3123 = shalt.err (!%p3120_p3)
}
  0x2c   : > { %2853 = dma.hbm_to_vmem [thread:$0]  (!%p3350_p12), %s3670_s2, 16, %s170_s27, [#allocation7]  }
  0x2d   : > { %p2154_p13 = scmp.ge.s32.totalorder %s3244_s17, 2 }
  0x2e   : > { %s3372_s20 = sand.u32 (!%p2154_p13), 1, %s3232_s14   ;;  %s2603_s22 = sshll.u32 (!%p2154_p13), %s3240_s16, 7 }
  0x2f   : > { %176 = sbr.rel (%p2154_p13) target bundleno = 89 (0x59), region = 20  ;;  %s3379_s28 = scalar_lea.hbm (!%p2154_p13), %s3668_s0, %s2603_s22 }
  0x30   : > { %s2827_s26 = smul.u32 (!%p2154_p13), 192, %s3372_s20  ;;  %s181_s5 = scalar_lea.sflag (!%p2154_p13), [#allocation4], %s3372_s20 }
  0x31   : > { %s3124_s6 = scalar_lea.hbm (!%p2154_p13), %s3379_s28, 3072  ;;  %p3680_p5 = scmp.ne.s32.totalorder (!%p2154_p13), %s3676_s21, 0 }
  0x32   : > { %s184_s27 = scalar_lea.vmem (!%p2154_p13), [#allocation3], %s2827_s26  ;;  %p3125_p3 = scmp.ne.s32.totalorder (!%p2154_p13), %s3379_s28, %s3124_s6 }
  0x33   : > { %s193_s4 = sshll.u32 (!%p2154_p13), %s184_s27, 4  ;;  %s3128_s9 = scalar_lea.hbm (!%p2154_p13), %s3668_s0, 6144  ;;  %s3381_s4 = int_to_ptr.vmem [resolvable:$true] %s193_s4 }
  0x34   : > { %p3126_p8 = pnand (!%p2154_p13), %p3125_p3, %p3680_p5  ;;  %p3129_p12 = scmp.lt.u32.totalorder (!%p2154_p13), %s3379_s28, %s3668_s0 }
  0x35   : > { %p3130_p0 = scmp.lt.u32.totalorder (!%p2154_p13), %s3128_s9, %s3124_s6  ;;  %p3132_p2 = scmp.lt.u32.totalorder (!%p2154_p13), %s3124_s6, %s3379_s28 }
  0x36   : > { %p3127_p10 = pneg %p3126_p8 }
  0x37   : > { %p3131_p1 = por %p3130_p0, %p3129_p12 }
  0x39   : > { %p3133_p4 = por %p3132_p2, %p3131_p1 }
  0x3b   : > { %p3134_p6 = pnand %p3133_p4, %p3127_p10 }
  0x3d   : > { %3137 = shalt.err (!%p3134_p6)
}
  0x3e   : > { %s3138_s12 = scalar_lea.vmem %s3381_s4, 3072  ;;  %s3251_s22 = smov [#allocation3]  }
  0x3f   : > { %p3139_p7 = scmp.ne.s32.totalorder %s3381_s4, %s3138_s12  ;;  %s3142_s26 = sshll.u32 %s3251_s22, 4  ;;  %s3143_s26 = int_to_ptr.vmem [resolvable:$false] %s3142_s26 }
  0x40   : > { %s3144_s29 = scalar_lea.vmem %s3143_s26, 6144  ;;  %p3145_p13 = scmp.lt.s32.totalorder %s3381_s4, %s3143_s26 }
  0x41   : > { %p3140_p9 = pnand %p3139_p7, %p3680_p5  ;;  %p3146_p3 = scmp.lt.s32.totalorder %s3144_s29, %s3138_s12 }
  0x43   : > { %p3141_p11 = pneg %p3140_p9  ;;  %p3147_p8 = por %p3146_p3, %p3145_p13 }
  0x45   : > { %p3148_p12 = pnand %p3147_p8, %p3141_p11 }
  0x47   : > { %3151 = shalt.err (!%p3148_p12)
}
  0x48   : > { %s3252_s30 = smov 256   ;;  %s3253_s27 = smov 128  }
  0x49   : > { %s3254_s6 = smov 8  }
  0x4a   : > { %2833 = dma.hbm_to_vmem [thread:$0]  (%p3680_p5), %s3379_s28, 3072, %s3381_s4, %s181_s5, %s3252_s30, %s3253_s27, %s3254_s6  }
  0x4b   : > { %s203_s7 = sand.u32 1, %s3244_s17   ;;  %s2828_s8 = smul.u32 1152, %s3372_s20 }
  0x4c   : > { %s2604_s9 = sshll.u32 %s3240_s16, 11  ;;  %s3255_s26 = smov 4096  }
  0x4d   : > { %s214_s12 = scalar_lea.hbm %s3669_s1, %s2604_s9  ;;  %s207_s28 = scalar_lea.vmem [#allocation6], %s2828_s8 }
  0x4e   : > { %s2834_s22 = scalar_select %p3680_p5, [#allocation0], [#allocation12] }
  0x4f   : > { %s227_s4 = sshll.u32 %s207_s28, 4  ;;  %2835 = sst [smem:[#allocation11]] (%p3680_p5), %s3255_s26  ;;  %s228_s4 = int_to_ptr.vmem [resolvable:$true] %s227_s4 }
  0x50   : > { %s219_s5 = sld [smem:[%s2834_s22]]   ;;  %s3256_s29 = smov 2048  }
  0x51   : > { %2836 = sst [smem:[#allocation11 + $0x1]] (%p3680_p5), %s3256_s29  ;;  %s3257_s20 = smov 32  }
  0x52   : > { %2837 = sst [smem:[#allocation11 + $0x2]] (%p3680_p5), %s3257_s20  ;;  %s3258_s30 = smov 64  }
  0x53   : > { %2838 = sst [smem:[#allocation11 + $0x3]] (%p3680_p5), %s3258_s30  ;;  %s3259_s6 = smov 4  }
  0x54   : > { %2839 = sst [smem:[#allocation11 + $0x4]] (%p3680_p5), %s3258_s30  ;;  %s204_s9 = scalar_lea.sflag [#allocation7], %s203_s7 }
  0x55   : > { %2840 = sst [smem:[#allocation11 + $0x5]] (%p3680_p5), %s3259_s6  ;;  %s3260_s10 = smov [#allocation10]  }
  0x56   : > { %s2159_s27 = sshll.u32 %s219_s5, 26 }
  0x57   : > { %s2160_s8 = sadd.s32 134217728, %s2159_s27 }
  0x58   : > { %2841 = dma.general (%p3680_p5), %s214_s12, 18432, %s228_s4, %s204_s9, %s3260_s10, [#allocation11], %s2160_s8, 0  }
  0x59 PF: > { %p3681_p10 = scmp.ne.s32.totalorder %s3678_s25, 0 }
  0x5a   : > { %s254_s11 = sand.u32 (!%p3681_p10), 1, %s3228_s13   ;;  %p3682_p0 = scmp.ne.s32.totalorder (!%p3681_p10), %s3677_s23, 0 }
  0x5b   : > { %252 = sbr.rel (%p3681_p10) target bundleno = 538 (0x21a), region = 32  ;;  %s255_s28 = scalar_lea.sflag (!%p3681_p10), [#allocation4], %s254_s11 }
  0x5c   : > { %s2829_s22 = smul.u32 (!%p3681_p10), 192, %s254_s11 }
  0x5e   : > { %s3432_s26 = scalar_lea.vmem (!%p3681_p10), [#allocation3], %s2829_s22 }
  0x62   : > { %3207 = dma.done.wait (%p3682_p0), %s255_s28, 3072  }
  0x63   : > { %3209 = vsyncadd (%p3682_p0), %s255_s28, 4294964224  ;;  %s263_s21 = sand.u32 1, %s3314_s18   ;;  %s2830_s7 = smul.u32 1152, %s254_s11 }
  0x64   : > { %s264_s12 = scalar_lea.sflag [#allocation7], %s263_s21 }
  0x65   : > { %s3439_s4 = scalar_lea.vmem [#allocation6], %s2830_s7 }
  0x66   : > { %3211 = dma.done.wait (%p3682_p0), %s264_s12, 18432  }
  0x67   : > { %3213 = vsyncadd (%p3682_p0), %s264_s12, 4294948864  ;;  %p3683_p5 = scmp.eq.s32.totalorder %s3314_s18, 0 }
  0x69   : > { %3215 = dma.done.wait (%p3683_p5), [#allocation7], 16   ;;  %p3684_p1 = pmov %p3683_p5 }
  0x6a   : > { %p2163_p2 = scmp.ne.s32.totalorder %s3236_s15, 0 }
  0x6b   : > { %3217 = vsyncadd (%p3684_p1), [#allocation7], 4294967280  ;;  %v3261_v0 = vmov (!%p2163_p2), 0.0  }
  0x6c   : > { %300 = sbr.rel (%p2163_p2) target bundleno = 115 (0x73), region = 48  ;;  %301 = vst [vmem:[#allocation2] sm:$0xff] (!%p2163_p2), %v3261_v0  ;;  %302 = vst [vmem:[#allocation2 + $0x8] sm:$0xff] (!%p2163_p2), %v3261_v0 }
  0x6d   : > { %303 = vst [vmem:[#allocation2 + $0x10] sm:$0xff] (!%p2163_p2), %v3261_v0  ;;  %304 = vst [vmem:[#allocation2 + $0x18] sm:$0xff] (!%p2163_p2), %v3261_v0 }
  0x6e   : > { %305 = vst [vmem:[#allocation2 + $0x20] sm:$0xff] (!%p2163_p2), %v3261_v0  ;;  %306 = vst [vmem:[#allocation2 + $0x28] sm:$0xff] (!%p2163_p2), %v3261_v0 }
  0x6f   : > { %307 = vst [vmem:[#allocation2 + $0x30] sm:$0xff] (!%p2163_p2), %v3261_v0  ;;  %308 = vst [vmem:[#allocation2 + $0x38] sm:$0xff] (!%p2163_p2), %v3261_v0 }
  0x73 PF: > { %s3450_s23 = smov 0  }
  0x74 LB: >> { %v2928_v1 = vld [vmem:[%s3439_s4 + $0x40] sm:$0xff]   ;;  %v2932_v5 = vld [vmem:[%s3439_s4 + $0x48] sm:$0xff]   ;;  %v2936_v9 = vld [vmem:[%s3439_s4 + $0x50] sm:$0xff]   ;;  %s2605_s25 = sshll.u32 %s3248_s23, 4  ;;  %s2164_s29 = sshll.u32 %s3248_s23, 3  ;;  %s3248_s23 = sphi %s3450_s23, %s314_s23  }
  0x75   : >> { %v2929_v2 = vld [vmem:[%s3439_s4] sm:$0xff]   ;;  %2629 = vmatprep.subr.bf16.mxu0 %v2928_v1  ;;  %v2933_v6 = vld [vmem:[%s3439_s4 + $0x8] sm:$0xff]   ;;  %v2937_v10 = vld [vmem:[%s3439_s4 + $0x10] sm:$0xff]   ;;  %s3486_s5 = scalar_lea.vmem %s3432_s26, %s2605_s25 [#allocation3]  ;;  %s3619_s20 = scalar_lea.vmem [#allocation2], %s2164_s29 }
  0x76   : >> { %v2930_v3 = vld [vmem:[%s3439_s4 + $0xc0] sm:$0xff]   ;;  %2630 = vmatpush3.bf16.msra.mxu0 %v2929_v2  ;;  %v2934_v7 = vld [vmem:[%s3439_s4 + $0xc8] sm:$0xff]   ;;  %v2938_v11 = vld [vmem:[%s3439_s4 + $0xd0] sm:$0xff]   ;;  %s314_s23 = sadd.s32 1, %s3248_s23  }
  0x77   : >> { %v2931_v4 = vld [vmem:[%s3439_s4 + $0x80] sm:$0xff]   ;;  %2651 = vmatprep.subr.bf16.mxu1 %v2930_v3  ;;  %2631 = vmatprep.subr.bf16.mxu0 %v2932_v5  ;;  %v2935_v8 = vld [vmem:[%s3439_s4 + $0x88] sm:$0xff]   ;;  %v2939_v12 = vld [vmem:[%s3439_s4 + $0x90] sm:$0xff]   ;;  %p311_p4 = scmp.ge.s32.totalorder %s314_s23, 8  }
  0x78   : >> { %2652 = vmatpush3.bf16.msra.mxu1 %v2931_v4  ;;  %v2940_v13 = vld [vmem:[%s3439_s4 + $0x58] sm:$0xff]   ;;  %v2944_v17 = vld [vmem:[%s3439_s4 + $0x60] sm:$0xff]   ;;  %v2948_v21 = vld [vmem:[%s3439_s4 + $0x68] sm:$0xff]   ;;  %p2597_p6 = scmp.ne.s32.totalorder (%p311_p4), %s3236_s15, 1 }
  0x79   : >> { %2653 = vmatprep.subr.bf16.mxu1 %v2934_v7  ;;  %v2941_v14 = vld [vmem:[%s3439_s4 + $0x18] sm:$0xff]   ;;  %v2945_v18 = vld [vmem:[%s3439_s4 + $0x20] sm:$0xff]   ;;  %v2949_v22 = vld [vmem:[%s3439_s4 + $0x28] sm:$0xff]  }
  0x7a   : >> { %2632 = vmatpush3.bf16.msra.mxu0 %v2933_v6  ;;  %v2942_v15 = vld [vmem:[%s3439_s4 + $0xd8] sm:$0xff]   ;;  %v2946_v19 = vld [vmem:[%s3439_s4 + $0xe0] sm:$0xff]   ;;  %v2950_v23 = vld [vmem:[%s3439_s4 + $0xe8] sm:$0xff]  }
  0x7b   : >> { %2633 = vmatprep.subr.bf16.mxu0 %v2936_v9  ;;  %v2943_v16 = vld [vmem:[%s3439_s4 + $0x98] sm:$0xff]   ;;  %v2947_v20 = vld [vmem:[%s3439_s4 + $0xa0] sm:$0xff]   ;;  %v2951_v24 = vld [vmem:[%s3439_s4 + $0xa8] sm:$0xff]  }
  0x7c   : >> { %2654 = vmatpush3.bf16.msra.mxu1 %v2935_v8  ;;  %v2952_v25 = vld [vmem:[%s3439_s4 + $0x70] sm:$0xff]   ;;  %v2956_v29 = vld [vmem:[%s3439_s4 + $0x78] sm:$0xff]   ;;  %v321_v32 = vld [vmem:[%s3486_s5] sm:$0xff] }
  0x7d   : >> { %2655 = vmatprep.subr.bf16.mxu1 %v2938_v11  ;;  %v2953_v26 = vld [vmem:[%s3439_s4 + $0x30] sm:$0xff]   ;;  %v2957_v30 = vld [vmem:[%s3439_s4 + $0x38] sm:$0xff]   ;;  %v2167_v33 = vcombine.low %v321_v32, %v321_v32  ;;  %v2168_v34 = vcombine.high %v321_v32, %v321_v32  ;;  %v2962_v36 = vld [vmem:[%s3439_s4 + $0x140] sm:$0xff]  }
  0x7e   : >> { %2634 = vmatpush3.bf16.msra.mxu0 %v2937_v10  ;;  %v2954_v27 = vld [vmem:[%s3439_s4 + $0xf0] sm:$0xff]   ;;  %v2958_v31 = vld [vmem:[%s3439_s4 + $0xf8] sm:$0xff]   ;;  %v2963_v37 = vld [vmem:[%s3486_s5] ss:$8 sps:$4 sm:$0x1e]  }
  0x7f   : >> { %2635 = vmatprep.subr.bf16.mxu0 %v2940_v13  ;;  %v2955_v28 = vld [vmem:[%s3439_s4 + $0xb0] sm:$0xff]   ;;  %v2961_v35 = vld [vmem:[%s3439_s4 + $0xb8] sm:$0xff]   ;;  %489 = vmatprep.mubr.bf16.mxu0 %v2168_v34  ;;  %v2965_v38 = vld [vmem:[%s3486_s5 + $0x4] ss:$8 sps:$4 sm:$0x1e]   ;;  %v541_v40 = vrot.slane %v2963_v37, 1 }
  0x80   : >> { %2656 = vmatpush3.bf16.msra.mxu1 %v2939_v12  ;;  %v2966_v39 = vld [vmem:[%s3439_s4 + $0x100] sm:$0xff]   ;;  %v542_v41 = vrot.slane %v2965_v38, 1  ;;  %v2969_v44 = vld [vmem:[%s3439_s4 + $0x148] sm:$0xff]   ;;  %v2973_v48 = vld [vmem:[%s3439_s4 + $0x150] sm:$0xff]  }
  0x81   : >> { %2657 = vmatprep.subr.bf16.mxu1 %v2942_v15  ;;  %v2967_v42 = vld [vmem:[%s3439_s4 + $0x1c0] sm:$0xff]   ;;  %v2970_v45 = vld [vmem:[%s3439_s4 + $0x108] sm:$0xff]   ;;  %v2974_v49 = vld [vmem:[%s3439_s4 + $0x110] sm:$0xff]  }
  0x82   : >> { %2636 = vmatpush3.bf16.msra.mxu0 %v2941_v14  ;;  %673 = vmatprep.mubr.bf16.mxu1 %v542_v41  ;;  %v2968_v43 = vld [vmem:[%s3439_s4 + $0x180] sm:$0xff]   ;;  %v2971_v46 = vld [vmem:[%s3439_s4 + $0x1c8] sm:$0xff]   ;;  %v2975_v50 = vld [vmem:[%s3439_s4 + $0x1d0] sm:$0xff]  }
  0x83   : >> { %2637 = vmatprep.subr.bf16.mxu0 %v2944_v17  ;;  %v2972_v47 = vld [vmem:[%s3439_s4 + $0x188] sm:$0xff]   ;;  %v2976_v51 = vld [vmem:[%s3439_s4 + $0x190] sm:$0xff]   ;;  %v2977_v52 = vld [vmem:[%s3439_s4 + $0x158] sm:$0xff]  }
  0x84   : >> { %2658 = vmatpush3.bf16.msra.mxu1 %v2943_v16  ;;  %v2978_v53 = vld [vmem:[%s3439_s4 + $0x118] sm:$0xff]   ;;  %v2981_v56 = vld [vmem:[%s3439_s4 + $0x160] sm:$0xff]   ;;  %v2985_v60 = vld [vmem:[%s3439_s4 + $0x168] sm:$0xff]  }
  0x85   : >> { %2659 = vmatprep.subr.bf16.mxu1 %v2946_v19  ;;  %v2979_v54 = vld [vmem:[%s3439_s4 + $0x1d8] sm:$0xff]   ;;  %v2982_v57 = vld [vmem:[%s3439_s4 + $0x120] sm:$0xff]   ;;  %v2986_v61 = vld [vmem:[%s3439_s4 + $0x128] sm:$0xff]  }
  0x86   : >> { %2638 = vmatpush3.bf16.msra.mxu0 %v2945_v18  ;;  %v2980_v55 = vld [vmem:[%s3439_s4 + $0x198] sm:$0xff]   ;;  %v2983_v58 = vld [vmem:[%s3439_s4 + $0x1e0] sm:$0xff]   ;;  %v2987_v62 = vld [vmem:[%s3439_s4 + $0x1e8] sm:$0xff]  }
  0x87   : >> { %2639 = vmatprep.subr.bf16.mxu0 %v2948_v21  ;;  %v2984_v59 = vld [vmem:[%s3439_s4 + $0x1a0] sm:$0xff]   ;;  %v2988_v63 = vld [vmem:[%s3439_s4 + $0x1a8] sm:$0xff]   ;;  %v2989_v0 = vld [vmem:[%s3439_s4 + $0x170] sm:$0xff]  }
  0x88   : >> { %2660 = vmatpush3.bf16.msra.mxu1 %v2947_v20  ;;  %v2990_v1 = vld [vmem:[%s3439_s4 + $0x130] sm:$0xff]   ;;  %v2993_v4 = vld [vmem:[%s3439_s4 + $0x178] sm:$0xff]   ;;  %v2996_v7 = vld [vmem:[%s3486_s5] ss:$8 sps:$4 sm:$0x3c]  }
  0x89   : >> { %2661 = vmatprep.subr.bf16.mxu1 %v2950_v23  ;;  %v2991_v2 = vld [vmem:[%s3439_s4 + $0x1f0] sm:$0xff]   ;;  %v2994_v5 = vld [vmem:[%s3439_s4 + $0x138] sm:$0xff]   ;;  %v2998_v8 = vld [vmem:[%s3486_s5 + $0x4] ss:$8 sps:$4 sm:$0x3c]   ;;  %v725_v10 = vrot.slane %v2996_v7, 2 }
  0x8a   : >> { %2640 = vmatpush3.bf16.msra.mxu0 %v2949_v22  ;;  %v2992_v3 = vld [vmem:[%s3439_s4 + $0x1b0] sm:$0xff]   ;;  %v2995_v6 = vld [vmem:[%s3439_s4 + $0x1f8] sm:$0xff]   ;;  %v726_v11 = vrot.slane %v2998_v8, 2  ;;  %v3000_v12 = vld [vmem:[%s3439_s4 + $0x240] sm:$0xff]  }
  0x8b   : >> { %2641 = vmatprep.subr.bf16.mxu0 %v2952_v25  ;;  %v2999_v9 = vld [vmem:[%s3439_s4 + $0x1b8] sm:$0xff]   ;;  %v2286_v13 = vld [vmem:[%s3486_s5 + $0x20] sm:$0xff]  ;;  %v3006_v19 = vld [vmem:[%s3439_s4 + $0x248] sm:$0xff]  }
  0x8c   : >> { %2662 = vmatpush3.bf16.msra.mxu1 %v2951_v24  ;;  %v2319_v14 = vcombine.low %v2286_v13, %v2286_v13  ;;  %v2320_v15 = vcombine.high %v2286_v13, %v2286_v13  ;;  %v3003_v16 = vld [vmem:[%s3439_s4 + $0x200] sm:$0xff]   ;;  %v3007_v20 = vld [vmem:[%s3439_s4 + $0x208] sm:$0xff]   ;;  %v3010_v23 = vld [vmem:[%s3439_s4 + $0x250] sm:$0xff]  }
  0x8d   : >> { %2663 = vmatprep.subr.bf16.mxu1 %v2954_v27  ;;  %v3004_v17 = vld [vmem:[%s3439_s4 + $0x2c0] sm:$0xff]   ;;  %v3008_v21 = vld [vmem:[%s3439_s4 + $0x2c8] sm:$0xff]   ;;  %v3011_v24 = vld [vmem:[%s3439_s4 + $0x210] sm:$0xff]  }
  0x8e   : >> { %2642 = vmatpush3.bf16.msra.mxu0 %v2953_v26  ;;  %v3005_v18 = vld [vmem:[%s3439_s4 + $0x280] sm:$0xff]   ;;  %v3009_v22 = vld [vmem:[%s3439_s4 + $0x288] sm:$0xff]   ;;  %v3012_v25 = vld [vmem:[%s3439_s4 + $0x2d0] sm:$0xff]  }
  0x8f   : >> { %2643 = vmatprep.subr.bf16.mxu0 %v2956_v29  ;;  %v3013_v26 = vld [vmem:[%s3439_s4 + $0x290] sm:$0xff]   ;;  %v3014_v27 = vld [vmem:[%s3439_s4 + $0x258] sm:$0xff]   ;;  %v3019_v32 = vld [vmem:[%s3439_s4 + $0x220] sm:$0xff]  }
  0x90   : >> { %2664 = vmatpush3.bf16.msra.mxu1 %v2955_v28  ;;  %v3015_v28 = vld [vmem:[%s3439_s4 + $0x218] sm:$0xff]   ;;  %v3021_v34 = vld [vmem:[%s3439_s4 + $0x2a0] sm:$0xff]   ;;  %v3024_v37 = vld [vmem:[%s3439_s4 + $0x2e8] sm:$0xff]  }
  0x91   : >> { %2665 = vmatprep.subr.bf16.mxu1 %v2958_v31  ;;  %v3016_v29 = vld [vmem:[%s3439_s4 + $0x2d8] sm:$0xff]   ;;  %v3018_v31 = vld [vmem:[%s3439_s4 + $0x260] sm:$0xff]   ;;  %v3025_v38 = vld [vmem:[%s3439_s4 + $0x2a8] sm:$0xff]  }
  0x92   : >> { %2644 = vmatpush3.bf16.msra.mxu0 %v2957_v30  ;;  %v3017_v30 = vld [vmem:[%s3439_s4 + $0x298] sm:$0xff]   ;;  %v3028_v41 = vld [vmem:[%s3439_s4 + $0x2f0] sm:$0xff]   ;;  %v3056_v7 = vld [vmem:[%s3439_s4 + $0x360] sm:$0xff]  }
  0x93   : >> { %2673 = vmatprep.subr.bf16.mxu0 %v2962_v36  ;;  %v3023_v36 = vld [vmem:[%s3439_s4 + $0x228] sm:$0xff]   ;;  %v3057_v8 = vld [vmem:[%s3439_s4 + $0x320] sm:$0xff]  }
  0x94   : >> { %2666 = vmatpush3.bf16.msra.mxu1 %v2961_v35  ;;  %v3022_v35 = vld [vmem:[%s3439_s4 + $0x268] sm:$0xff]  }
  0x95   : >> { %490 = vmatmul.mubr.bf16.vlgmr.msra.gmra.mrb[0].mxu0 %v2167_v33  ;;  %2695 = vmatprep.subr.bf16.mxu1 %v2967_v42  ;;  %v3020_v33 = vld [vmem:[%s3439_s4 + $0x2e0] sm:$0xff]   ;;  %v3029_v42 = vld [vmem:[%s3439_s4 + $0x2b0] sm:$0xff]   ;;  %v3062_v13 = vld [vmem:[%s3439_s4 + $0x3e8] sm:$0xff]  }
  0x96   : >> { %2674 = vmatpush3.bf16.msra.mxu0 %v2966_v39  ;;  %857 = vmatprep.mubr.bf16.mxu0 %v726_v11  ;;  %v3026_v39 = vld [vmem:[%s3439_s4 + $0x270] sm:$0xff]   ;;  %v3060_v11 = vld [vmem:[%s3439_s4 + $0x368] sm:$0xff]  }
  0x97   : >> { %674 = vmatmul.mubr.bf16.vlgmr.msra.gmra.mrb[0].mxu1 %v541_v40  ;;  %2675 = vmatprep.subr.bf16.mxu0 %v2969_v44  ;;  %v3027_v40 = vld [vmem:[%s3439_s4 + $0x230] sm:$0xff]   ;;  %v3031_v44 = vld [vmem:[%s3439_s4 + $0x238] sm:$0xff]  }
  0x98   : >> { %2696 = vmatpush3.bf16.msra.mxu1 %v2968_v43  ;;  %1039 = vmatprep.mubr.bf16.mxu1 %v2320_v15  ;;  %v3030_v43 = vld [vmem:[%s3439_s4 + $0x278] sm:$0xff]   ;;  %v3064_v15 = vld [vmem:[%s3439_s4 + $0x370] sm:$0xff]  }
  0x99   : >> { %2697 = vmatprep.subr.bf16.mxu1 %v2971_v46  ;;  %v3033_v46 = vld [vmem:[%s3486_s5 + $0x20] ss:$8 sps:$4 sm:$0x1e]  }
  0x9a   : >> { %2676 = vmatpush3.bf16.msra.mxu0 %v2970_v45  ;;  %v3032_v45 = vld [vmem:[%s3439_s4 + $0x2f8] sm:$0xff]  }
  0x9b   : >> { %2677 = vmatprep.subr.bf16.mxu0 %v2973_v48  ;;  %v3035_v48 = vld [vmem:[%s3486_s5 + $0x24] ss:$8 sps:$4 sm:$0x1e]  }
  0x9c   : >> { %2698 = vmatpush3.bf16.msra.mxu1 %v2972_v47  ;;  %v3036_v47 = vld [vmem:[%s3439_s4 + $0x2b8] sm:$0xff]  }
  0x9d   : >> { %2699 = vmatprep.subr.bf16.mxu1 %v2975_v50  ;;  %v1091_v50 = vrot.slane %v3033_v46, 1  ;;  %v3091_v46 = vld [vmem:[%s3439_s4 + $0x478] sm:$0xff]  }
  0x9e   : >> { %2678 = vmatpush3.bf16.msra.mxu0 %v2974_v49  ;;  %v3037_v49 = vld [vmem:[%s3439_s4 + $0x340] sm:$0xff]  }
  0x9f   : >> { %2679 = vmatprep.subr.bf16.mxu0 %v2977_v52  ;;  %v1092_v52 = vrot.slane %v3035_v48, 1  ;;  %v3092_v48 = vld [vmem:[%s3439_s4 + $0x438] sm:$0xff]  }
  0xa0   : >> { %2700 = vmatpush3.bf16.msra.mxu1 %v2976_v51  ;;  %v3041_v51 = vld [vmem:[%s3439_s4 + $0x300] sm:$0xff]  }
  0xa1   : >> { %2701 = vmatprep.subr.bf16.mxu1 %v2979_v54  ;;  %v3038_v54 = vld [vmem:[%s3486_s5 + $0x20] ss:$8 sps:$4 sm:$0x3c]  }
  0xa2   : >> { %2680 = vmatpush3.bf16.msra.mxu0 %v2978_v53  ;;  %v3042_v53 = vld [vmem:[%s3439_s4 + $0x3c0] sm:$0xff]  }
  0xa3   : >> { %2681 = vmatprep.subr.bf16.mxu0 %v2981_v56  ;;  %v3043_v56 = vld [vmem:[%s3439_s4 + $0x380] sm:$0xff]  }
  0xa4   : >> { %2702 = vmatpush3.bf16.msra.mxu1 %v2980_v55  ;;  %v3040_v55 = vld [vmem:[%s3486_s5 + $0x24] ss:$8 sps:$4 sm:$0x3c]  }
  0xa5   : >> { %2703 = vmatprep.subr.bf16.mxu1 %v2983_v58  ;;  %v1275_v58 = vrot.slane %v3038_v54, 2 }
  0xa6   : >> { %2682 = vmatpush3.bf16.msra.mxu0 %v2982_v57  ;;  %v3044_v57 = vld [vmem:[%s3439_s4 + $0x348] sm:$0xff]  }
  0xa7   : >> { %2683 = vmatprep.subr.bf16.mxu0 %v2985_v60  ;;  %v1276_v60 = vrot.slane %v3040_v55, 2 }
  0xa8   : >> { %2704 = vmatpush3.bf16.msra.mxu1 %v2984_v59  ;;  %v3045_v59 = vld [vmem:[%s3439_s4 + $0x308] sm:$0xff]  }
  0xa9   : >> { %2705 = vmatprep.subr.bf16.mxu1 %v2987_v62  ;;  %v3047_v62 = vld [vmem:[%s3439_s4 + $0x388] sm:$0xff]  }
  0xaa   : >> { %2684 = vmatpush3.bf16.msra.mxu0 %v2986_v61  ;;  %v3046_v61 = vld [vmem:[%s3439_s4 + $0x3c8] sm:$0xff]  }
  0xab   : >> { %2685 = vmatprep.subr.bf16.mxu0 %v2989_v0  ;;  %v3049_v0 = vld [vmem:[%s3439_s4 + $0x310] sm:$0xff]  }
  0xac   : >> { %2706 = vmatpush3.bf16.msra.mxu1 %v2988_v63  ;;  %v3048_v63 = vld [vmem:[%s3439_s4 + $0x350] sm:$0xff]  }
  0xad   : >> { %2707 = vmatprep.subr.bf16.mxu1 %v2991_v2  ;;  %v3051_v2 = vld [vmem:[%s3439_s4 + $0x390] sm:$0xff]  }
  0xae   : >> { %2686 = vmatpush3.bf16.msra.mxu0 %v2990_v1  ;;  %v3050_v1 = vld [vmem:[%s3439_s4 + $0x3d0] sm:$0xff]  }
  0xaf   : >> { %2687 = vmatprep.subr.bf16.mxu0 %v2993_v4  ;;  %v3053_v4 = vld [vmem:[%s3439_s4 + $0x318] sm:$0xff]  }
  0xb0   : >> { %2708 = vmatpush3.bf16.msra.mxu1 %v2992_v3  ;;  %v3052_v3 = vld [vmem:[%s3439_s4 + $0x358] sm:$0xff]  }
  0xb1   : >> { %2709 = vmatprep.subr.bf16.mxu1 %v2995_v6  ;;  %v3055_v6 = vld [vmem:[%s3439_s4 + $0x398] sm:$0xff]  }
  0xb2   : >> { %2688 = vmatpush3.bf16.msra.mxu0 %v2994_v5  ;;  %v3054_v5 = vld [vmem:[%s3439_s4 + $0x3d8] sm:$0xff]  }
  0xb3   : >> { %2717 = vmatprep.subr.bf16.mxu0 %v3000_v12  ;;  %v3061_v12 = vld [vmem:[%s3439_s4 + $0x328] sm:$0xff]  }
  0xb4   : >> { %2710 = vmatpush3.bf16.msra.mxu1 %v2999_v9  ;;  %v3058_v9 = vld [vmem:[%s3439_s4 + $0x3e0] sm:$0xff]  }
  0xb5   : >> { %858 = vmatmul.mubr.bf16.vlgmr.msra.gmra.mrb[4].mxu0 %v725_v10  ;;  %2739 = vmatprep.subr.bf16.mxu1 %v3004_v17  ;;  %v3059_v10 = vld [vmem:[%s3439_s4 + $0x3a0] sm:$0xff]   ;;  %v3066_v17 = vld [vmem:[%s3439_s4 + $0x3f0] sm:$0xff]  }
  0xb6   : >> { %2718 = vmatpush3.bf16.msra.mxu0 %v3003_v16  ;;  %1223 = vmatprep.mubr.bf16.mxu0 %v1092_v52  ;;  %v3065_v16 = vld [vmem:[%s3439_s4 + $0x330] sm:$0xff]  }
  0xb7   : >> { %1040 = vmatmul.mubr.bf16.vlgmr.msra.gmra.mrb[4].mxu1 %v2319_v14  ;;  %2719 = vmatprep.subr.bf16.mxu0 %v3006_v19  ;;  %v3063_v14 = vld [vmem:[%s3439_s4 + $0x3a8] sm:$0xff]   ;;  %v3068_v19 = vld [vmem:[%s3439_s4 + $0x378] sm:$0xff]  }
  0xb8   : >> { %2740 = vmatpush3.bf16.msra.mxu1 %v3005_v18  ;;  %1407 = vmatprep.mubr.bf16.mxu1 %v1276_v60  ;;  %v3067_v18 = vld [vmem:[%s3439_s4 + $0x3b0] sm:$0xff]  }
  0xb9   : >> { %2741 = vmatprep.subr.bf16.mxu1 %v3008_v21  ;;  %v3070_v21 = vld [vmem:[%s3439_s4 + $0x3f8] sm:$0xff]  }
  0xba   : >> { %2720 = vmatpush3.bf16.msra.mxu0 %v3007_v20  ;;  %v3069_v20 = vld [vmem:[%s3439_s4 + $0x338] sm:$0xff]  }
  0xbb   : >> { %2721 = vmatprep.subr.bf16.mxu0 %v3010_v23 }
  0xbc   : >> { %2742 = vmatpush3.bf16.msra.mxu1 %v3009_v22  ;;  %v2442_v22 = vld [vmem:[%s3486_s5 + $0x40] sm:$0xff] }
  0xbd   : >> { %2743 = vmatprep.subr.bf16.mxu1 %v3012_v25  ;;  %v2475_v23 = vcombine.low %v2442_v22, %v2442_v22  ;;  %v3073_v25 = vld [vmem:[%s3439_s4 + $0x3b8] sm:$0xff]  }
  0xbe   : >> { %2722 = vmatpush3.bf16.msra.mxu0 %v3011_v24  ;;  %v2476_v24 = vcombine.high %v2442_v22, %v2442_v22 }
  0xbf   : >> { %2723 = vmatprep.subr.bf16.mxu0 %v3014_v27  ;;  %v3075_v27 = vld [vmem:[%s3486_s5 + $0x40] ss:$8 sps:$4 sm:$0x1e]  }
  0xc0   : >> { %2744 = vmatpush3.bf16.msra.mxu1 %v3013_v26  ;;  %v3074_v26 = vld [vmem:[%s3439_s4 + $0x440] sm:$0xff]  }
  0xc1   : >> { %2745 = vmatprep.subr.bf16.mxu1 %v3016_v29  ;;  %v3077_v29 = vld [vmem:[%s3486_s5 + $0x44] ss:$8 sps:$4 sm:$0x1e]  }
  0xc2   : >> { %2724 = vmatpush3.bf16.msra.mxu0 %v3015_v28  ;;  %v3078_v28 = vld [vmem:[%s3439_s4 + $0x400] sm:$0xff]  }
  0xc3   : >> { %2725 = vmatprep.subr.bf16.mxu0 %v3018_v31  ;;  %v1641_v31 = vrot.slane %v3075_v27, 1 }
  0xc4   : >> { %2746 = vmatpush3.bf16.msra.mxu1 %v3017_v30  ;;  %v3079_v30 = vld [vmem:[%s3439_s4 + $0x448] sm:$0xff]  }
  0xc5   : >> { %2747 = vmatprep.subr.bf16.mxu1 %v3020_v33  ;;  %v1642_v33 = vrot.slane %v3077_v29, 1 }
  0xc6   : >> { %2726 = vmatpush3.bf16.msra.mxu0 %v3019_v32  ;;  %v3080_v32 = vld [vmem:[%s3439_s4 + $0x408] sm:$0xff]  }
  0xc7   : >> { %2727 = vmatprep.subr.bf16.mxu0 %v3022_v35  ;;  %v3082_v35 = vld [vmem:[%s3439_s4 + $0x410] sm:$0xff]  }
  0xc8   : >> { %2748 = vmatpush3.bf16.msra.mxu1 %v3021_v34  ;;  %v3081_v34 = vld [vmem:[%s3439_s4 + $0x450] sm:$0xff]  }
  0xc9   : >> { %2749 = vmatprep.subr.bf16.mxu1 %v3024_v37  ;;  %v3084_v37 = vld [vmem:[%s3439_s4 + $0x418] sm:$0xff]  }
  0xca   : >> { %2728 = vmatpush3.bf16.msra.mxu0 %v3023_v36  ;;  %v3083_v36 = vld [vmem:[%s3439_s4 + $0x458] sm:$0xff]  }
  0xcb   : >> { %2729 = vmatprep.subr.bf16.mxu0 %v3026_v39  ;;  %v3086_v39 = vld [vmem:[%s3439_s4 + $0x420] sm:$0xff]  }
  0xcc   : >> { %2750 = vmatpush3.bf16.msra.mxu1 %v3025_v38  ;;  %v3085_v38 = vld [vmem:[%s3439_s4 + $0x460] sm:$0xff]  }
  0xcd   : >> { %2751 = vmatprep.subr.bf16.mxu1 %v3028_v41  ;;  %v3095_v41 = vld [vmem:[%s3486_s5 + $0x44] ss:$8 sps:$4 sm:$0x3c]  }
  0xce   : >> { %2730 = vmatpush3.bf16.msra.mxu0 %v3027_v40  ;;  %v3087_v40 = vld [vmem:[%s3439_s4 + $0x468] sm:$0xff]  }
  0xcf   : >> { %2731 = vmatprep.subr.bf16.mxu0 %v3030_v43  ;;  %v3089_v43 = vld [vmem:[%s3439_s4 + $0x470] sm:$0xff]  }
  0xd0   : >> { %2752 = vmatpush3.bf16.msra.mxu1 %v3029_v42  ;;  %v3088_v42 = vld [vmem:[%s3439_s4 + $0x428] sm:$0xff]  }
  0xd1   : >> { %2753 = vmatprep.subr.bf16.mxu1 %v3032_v45  ;;  %v3090_v45 = vld [vmem:[%s3439_s4 + $0x430] sm:$0xff]  }
  0xd2   : >> { %2732 = vmatpush3.bf16.msra.mxu0 %v3031_v44  ;;  %v1826_v44 = vrot.slane %v3095_v41, 2 }
  0xd3   : >> { %2761 = vmatprep.subr.bf16.mxu0 %v3037_v49 }
  0xd4   : >> { %2754 = vmatpush3.bf16.msra.mxu1 %v3036_v47  ;;  %v3093_v47 = vld [vmem:[%s3486_s5 + $0x40] ss:$8 sps:$4 sm:$0x3c]  }
  0xd5   : >> { %2783 = vmatprep.subr.bf16.mxu1 %v3042_v53  ;;  %1224 = vmatmul.mubr.bf16.vlgmr.msra.gmra.mrb[8].mxu0 %v1091_v50  ;;  %v1825_v49 = vrot.slane %v3093_v47, 2 }
  0xd6   : >> { %2762 = vmatpush3.bf16.msra.mxu0 %v3041_v51  ;;  %1589 = vmatprep.mubr.bf16.mxu0 %v2476_v24  ;;  %v317_v51 = vld [vmem:[%s3619_s20] sm:$0xff] }
  0xd7   : >> { %2763 = vmatprep.subr.bf16.mxu0 %v3044_v57  ;;  %1408 = vmatmul.mubr.bf16.vlgmr.msra.gmra.mrb[8].mxu1 %v1275_v58 }
  0xd8   : >> { %2784 = vmatpush3.bf16.msra.mxu1 %v3043_v56  ;;  %1773 = vmatprep.mubr.bf16.mxu1 %v1642_v33 }
  0xd9   : >> { %2785 = vmatprep.subr.bf16.mxu1 %v3046_v61 }
  0xda   : >> { %2764 = vmatpush3.bf16.msra.mxu0 %v3045_v59 }
  0xdb   : >> { %2765 = vmatprep.subr.bf16.mxu0 %v3048_v63 }
  0xdc   : >> { %2786 = vmatpush3.bf16.msra.mxu1 %v3047_v62 }
  0xdd   : >> { %2787 = vmatprep.subr.bf16.mxu1 %v3050_v1 }
  0xde   : >> { %2766 = vmatpush3.bf16.msra.mxu0 %v3049_v0 }
  0xdf   : >> { %2767 = vmatprep.subr.bf16.mxu0 %v3052_v3 }
  0xe0   : >> { %2788 = vmatpush3.bf16.msra.mxu1 %v3051_v2 }
  0xe1   : >> { %2789 = vmatprep.subr.bf16.mxu1 %v3054_v5 }
  0xe2   : >> { %2768 = vmatpush3.bf16.msra.mxu0 %v3053_v4 }
  0xe3   : >> { %2769 = vmatprep.subr.bf16.mxu0 %v3056_v7 }
  0xe4   : >> { %2790 = vmatpush3.bf16.msra.mxu1 %v3055_v6 }
  0xe5   : >> { %2791 = vmatprep.subr.bf16.mxu1 %v3058_v9 }
  0xe6   : >> { %2770 = vmatpush3.bf16.msra.mxu0 %v3057_v8 }
  0xe7   : >> { %2771 = vmatprep.subr.bf16.mxu0 %v3060_v11 }
  0xe8   : >> { %2792 = vmatpush3.bf16.msra.mxu1 %v3059_v10 }
  0xe9   : >> { %2793 = vmatprep.subr.bf16.mxu1 %v3062_v13 }
  0xea   : >> { %2772 = vmatpush3.bf16.msra.mxu0 %v3061_v12 }
  0xeb   : >> { %2773 = vmatprep.subr.bf16.mxu0 %v3064_v15 }
  0xec   : >> { %2794 = vmatpush3.bf16.msra.mxu1 %v3063_v14 }
  0xed   : >> { %2795 = vmatprep.subr.bf16.mxu1 %v3066_v17 }
  0xee   : >> { %2774 = vmatpush3.bf16.msra.mxu0 %v3065_v16 }
  0xef   : >> { %2775 = vmatprep.subr.bf16.mxu0 %v3068_v19 }
  0xf0   : >> { %2796 = vmatpush3.bf16.msra.mxu1 %v3067_v18 }
  0xf1   : >> { %2797 = vmatprep.subr.bf16.mxu1 %v3070_v21 }
  0xf2   : >> { %2776 = vmatpush3.bf16.msra.mxu0 %v3069_v20 }
  0xf3   : >> { %2805 = vmatprep.subr.bf16.mxu0 %v3074_v26 }
  0xf4   : >> { %2798 = vmatpush3.bf16.msra.mxu1 %v3073_v25 }
  0xf5   : >> { %1590 = vmatmul.mubr.bf16.vlgmr.msra.gmra.mrb[12].mxu0 %v2475_v23 }
  0xf6   : >> { %2806 = vmatpush3.bf16.msra.mxu0 %v3078_v28  ;;  %1957 = vmatprep.mubr.bf16.mxu0 %v1826_v44 }
  0xf7   : >> { %2807 = vmatprep.subr.bf16.mxu0 %v3079_v30  ;;  %1774 = vmatmul.mubr.bf16.vlgmr.msra.gmra.mrb[12].mxu1 %v1641_v31 }
  0xfa   : >> { %2808 = vmatpush3.bf16.msra.mxu0 %v3080_v32 }
  0xfb   : >> { %2809 = vmatprep.subr.bf16.mxu0 %v3081_v34 }
  0xfe   : >> { %2810 = vmatpush3.bf16.msra.mxu0 %v3082_v35 }
  0xff   : >> { %2811 = vmatprep.subr.bf16.mxu0 %v3083_v36 }
 0x102   : >> { %2812 = vmatpush3.bf16.msra.mxu0 %v3084_v37 }
 0x103   : >> { %2813 = vmatprep.subr.bf16.mxu0 %v3085_v38 }
 0x106   : >> { %2814 = vmatpush3.bf16.msra.mxu0 %v3086_v39 }
 0x107   : >> { %2815 = vmatprep.subr.bf16.mxu0 %v3087_v40 }
 0x10a   : >> { %2816 = vmatpush3.bf16.msra.mxu0 %v3088_v42 }
 0x10b   : >> { %2817 = vmatprep.subr.bf16.mxu0 %v3089_v43 }
 0x10e   : >> { %2818 = vmatpush3.bf16.msra.mxu0 %v3090_v45 }
 0x10f   : >> { %2819 = vmatprep.subr.bf16.mxu0 %v3091_v46 }
 0x112   : >> { %2820 = vmatpush3.bf16.msra.mxu0 %v3092_v48 }
 0x115   : >> { %1958 = vmatmul.mubr.bf16.vlgmr.msra.gmra.mrb[16].mxu0 %v1825_v49 }
 0x168   : >> { %v2645_v50 = vpop.f32.mrb[0].mxu0 }
 0x169   : >> { %v2646_v52 = vpop.f32.mrb[1].mxu0 }
 0x16a   : >> { %v2647_v53 = vadd.f32 %v2646_v52, %v2645_v50  ;;  %v2648_v54 = vpop.f32.mrb[2].mxu0  ;;  %v2667_v57 = vpop.f32.mrb[0].mxu1 }
 0x16b   : >> { %v2649_v55 = vpop.f32.mrb[3].mxu0  ;;  %v2668_v58 = vpop.f32.mrb[1].mxu1 }
 0x16c   : >> { %v497_v56 = vadd.f32 %v2647_v53, %v317_v51  ;;  %v2669_v59 = vadd.f32 %v2668_v58, %v2667_v57  ;;  %v2670_v60 = vpop.f32.mrb[2].mxu1 }
 0x16d   : >> { %v2671_v61 = vpop.f32.mrb[3].mxu1 }
 0x16e   : >> { %v681_v62 = vadd.f32 %v2669_v59, %v497_v56 }
 0x188   : >> { %v2689_v63 = vpop.f32.mrb[4].mxu0 }
 0x189   : >> { %v2690_v0 = vpop.f32.mrb[5].mxu0 }
 0x18a   : >> { %v2691_v1 = vadd.f32 %v2690_v0, %v2689_v63  ;;  %v2692_v2 = vpop.f32.mrb[6].mxu0  ;;  %v2711_v3 = vpop.f32.mrb[4].mxu1 }
 0x18b   : >> { %v2693_v4 = vpop.f32.mrb[7].mxu0  ;;  %v2712_v5 = vpop.f32.mrb[5].mxu1 }
 0x18c   : >> { %v865_v6 = vadd.f32 %v2691_v1, %v681_v62  ;;  %v2713_v7 = vadd.f32 %v2712_v5, %v2711_v3  ;;  %v2714_v8 = vpop.f32.mrb[6].mxu1 }
 0x18d   : >> { %v2715_v9 = vpop.f32.mrb[7].mxu1 }
 0x18e   : >> { %v1047_v10 = vadd.f32 %v2713_v7, %v865_v6 }
 0x1a8   : >> { %v2733_v11 = vpop.f32.mrb[8].mxu0 }
 0x1a9   : >> { %v2734_v12 = vpop.f32.mrb[9].mxu0 }
 0x1aa   : >> { %v2735_v13 = vadd.f32 %v2734_v12, %v2733_v11  ;;  %v2736_v14 = vpop.f32.mrb[10].mxu0  ;;  %v2755_v17 = vpop.f32.mrb[8].mxu1 }
 0x1ab   : >> { %v2737_v15 = vpop.f32.mrb[11].mxu0  ;;  %v2756_v18 = vpop.f32.mrb[9].mxu1 }
 0x1ac   : >> { %v1231_v16 = vadd.f32 %v2735_v13, %v1047_v10  ;;  %v2757_v19 = vadd.f32 %v2756_v18, %v2755_v17  ;;  %v2758_v20 = vpop.f32.mrb[10].mxu1 }
 0x1ad   : >> { %v2759_v21 = vpop.f32.mrb[11].mxu1 }
 0x1ae   : >> { %v1415_v22 = vadd.f32 %v2757_v19, %v1231_v16 }
 0x1c8   : >> { %v2777_v23 = vpop.f32.mrb[12].mxu0 }
 0x1c9   : >> { %v2778_v24 = vpop.f32.mrb[13].mxu0 }
 0x1ca   : >> { %v2779_v25 = vadd.f32 %v2778_v24, %v2777_v23  ;;  %v2780_v26 = vpop.f32.mrb[14].mxu0  ;;  %v2799_v29 = vpop.f32.mrb[12].mxu1 }
 0x1cb   : >> { %v2781_v27 = vpop.f32.mrb[15].mxu0  ;;  %v2800_v30 = vpop.f32.mrb[13].mxu1 }
 0x1cc   : >> { %v1597_v28 = vadd.f32 %v2779_v25, %v1415_v22  ;;  %v2801_v31 = vadd.f32 %v2800_v30, %v2799_v29  ;;  %v2802_v32 = vpop.f32.mrb[14].mxu1 }
 0x1cd   : >> { %v2803_v33 = vpop.f32.mrb[15].mxu1 }
 0x1ce   : >> { %v1781_v34 = vadd.f32 %v2801_v31, %v1597_v28 }
 0x1e8   : >> { %v2821_v35 = vpop.f32.mrb[16].mxu0  ;;  %313 = sbr.rel (!%p311_p4) target bundleno = 116 (0x74), region = 120 }
 0x1e9   : >> { %v2822_v36 = vpop.f32.mrb[17].mxu0 }
 0x1ea   : >> { %v2823_v37 = vadd.f32 %v2822_v36, %v2821_v35  ;;  %v2824_v38 = vpop.f32.mrb[18].mxu0 }
 0x1eb   : >> { %v2825_v39 = vpop.f32.mrb[19].mxu0 }
 0x1ec   : >> { %v1965_v40 = vadd.f32 %v2823_v37, %v1781_v34 }
 0x1ee   : >> { %1966 = vst [vmem:[%s3619_s20] sm:$0xff] %v1965_v40 }
 0x1ef   : > { %1970 = sbr.rel (%p2597_p6) target bundleno = 512 (0x200), region = 59  ;;  %v2598_v43 = vld [vmem:[#allocation8] ss:$0 sm:$0xff] (!%p2597_p6) }
 0x1f5   : > { %v1971_v41 = vld [vmem:[#allocation2] sm:$0xff] (!%p2597_p6)  ;;  %v1972_v42 = vld [vmem:[#allocation2 + $0x8] sm:$0xff] (!%p2597_p6)  ;;  %v1973_v46 = vld [vmem:[#allocation2 + $0x10] sm:$0xff] (!%p2597_p6) }
 0x1f6   : > { %v1986_v44 = vadd.f32 %v2598_v43, %v1971_v41  ;;  %v1987_v45 = vadd.f32 %v2598_v43, %v1972_v42  ;;  %v1974_v47 = vld [vmem:[#allocation2 + $0x18] sm:$0xff]  ;;  %v1975_v48 = vld [vmem:[#allocation2 + $0x20] sm:$0xff]  ;;  %v1988_v49 = vadd.f32 %v2598_v43, %v1973_v46  ;;  %v1976_v51 = vld [vmem:[#allocation2 + $0x28] sm:$0xff] }
 0x1f7   : > { %v1989_v50 = vadd.f32 %v2598_v43, %v1974_v47  ;;  %v1990_v52 = vadd.f32 %v2598_v43, %v1975_v48  ;;  %v1977_v53 = vld [vmem:[#allocation2 + $0x30] sm:$0xff]  ;;  %v1978_v54 = vld [vmem:[#allocation2 + $0x38] sm:$0xff]  ;;  %v1991_v57 = vadd.f32 %v2598_v43, %v1976_v51 }
 0x1f8   : > { %v1994_v55 = vmax.f32 %v1986_v44, 0.0  ;;  %v1995_v56 = vmax.f32 %v1987_v45, 0.0  ;;  %v1992_v58 = vadd.f32 %v2598_v43, %v1977_v53  ;;  %v1996_v59 = vmax.f32 %v1988_v49, 0.0 }
 0x1f9   : > { %v1997_v60 = vmax.f32 %v1989_v50, 0.0  ;;  %v1998_v61 = vmax.f32 %v1990_v52, 0.0  ;;  %v1993_v62 = vadd.f32 %v2598_v43, %v1978_v54  ;;  %v1999_v0 = vmax.f32 %v1991_v57, 0.0 }
 0x1fa   : > { %v2609_v63 = vpack.c.bf16 %v1995_v56, %v1994_v55  ;;  %v2000_v1 = vmax.f32 %v1992_v58, 0.0 }
 0x1fb   : > { %v2614_v2 = vpack.c.bf16 %v1997_v60, %v1996_v59  ;;  %v2001_v3 = vmax.f32 %v1993_v62, 0.0  ;;  %v2619_v4 = vpack.c.bf16 %v1999_v0, %v1998_v61 }
 0x1fc   : > { %2610 = vst [vmem:[#allocation9] sm:$0xff] %v2609_v63  }
 0x1fd   : > { %2626 = vst [vmem:[#allocation9 + $0x8] sm:$0xff] %v2614_v2   ;;  %v2624_v5 = vpack.c.bf16 %v2001_v3, %v2000_v1  ;;  %2627 = vst [vmem:[#allocation9 + $0x10] sm:$0xff] %v2619_v4  }
 0x1ff   : > { %2628 = vst [vmem:[#allocation9 + $0x18] sm:$0xff] %v2624_v5  }
 0x200 PF: > { %p2856_p7 = scmp.eq.s32.totalorder %s3314_s18, 1  ;;  %s3262_s15 = smov [#allocation9]  }
 0x201   : > { %s2028_s30 = sshll.u32 %s3262_s15, 4  ;;  %s2029_s30 = int_to_ptr.vmem [resolvable:$true] %s2028_s30 }
 0x202   : > { %s3152_s27 = scalar_lea.vmem %s2029_s30, 512  ;;  %p3159_p3 = scmp.lt.s32.totalorder %s2029_s30, %s2029_s30 }
 0x203   : > { %p3153_p9 = scmp.ne.s32.totalorder %s2029_s30, %s3152_s27  ;;  %p3160_p8 = scmp.lt.s32.totalorder %s3152_s27, %s3152_s27 }
 0x205   : > { %p3154_p11 = pnand %p3153_p9, %p2856_p7  ;;  %p3161_p12 = por %p3160_p8, %p3159_p3 }
 0x207   : > { %p3155_p13 = pneg %p3154_p11 }
 0x209   : > { %p3162_p10 = pnand %p3161_p12, %p3155_p13 }
 0x20b   : > { %3165 = shalt.err (!%p3162_p10)
}
 0x20c   : > { %s3166_s9 = scalar_lea.hbm %s3671_s3, 512 }
 0x20d   : > { %p3167_p0 = scmp.ne.s32.totalorder %s3671_s3, %s3166_s9  ;;  %p3172_p2 = scmp.lt.u32.totalorder %s3166_s9, %s3671_s3 }
 0x20f   : > { %p3168_p5 = pnand %p3167_p0, %p2856_p7 }
 0x211   : > { %p3169_p1 = pneg %p3168_p5 }
 0x213   : > { %p3174_p4 = pnand %p3172_p2, %p3169_p1 }
 0x215   : > { %3177 = shalt.err (!%p3174_p4)
}
 0x216   : > { %s3263_s26 = smov 64   ;;  %s3264_s21 = smov 4  }
 0x217   : > { %2847 = dma.vmem_to_hbm [thread:$0]  (%p2856_p7), %s2029_s30, 512, %s3671_s3, [#allocation5], %s3263_s26, %s3263_s26, %s3264_s21  }
 0x218   : > { %3219 = dma.done.wait (%p2856_p7), [#allocation5], 512  }
 0x219   : > { %3221 = vsyncadd (%p2856_p7), [#allocation5], 4294966784 }
 0x21a PF: > { %s20_s17 = sadd.s32 1, %s3244_s17   ;;  %s3685_s12 = smov %s3228_s13 }
 0x21b   : > { %p17_p6 = scmp.ge.s32.totalorder %s20_s17, 4   ;;  %s3686_s13 = smov %s3232_s14 }
 0x21c   : > { %s3687_s14 = smov %s3340_s24  ;;  %s3688_s15 = smov %s3240_s16 }
 0x21d   : > { %s3689_s16 = smov %s3691_s19  ;;  %19 = sbr.rel (!%p17_p6) target bundleno = 7 (0x7), region = 131 }
 0x224   :  { %2044 = vsyncpa [#allocation4], 1 }
 0x225   :  { %2046 = vsyncpa [#allocation4 + $0x1], 1 }
 0x226   :  { %2047 = vsyncpa [#allocation7], 1 }
 0x227   :  { %2049 = vsyncpa [#allocation7 + $0x1], 1 }
 0x228   :  { %2050 = vsyncpa [#allocation5], 1 }
 0x229   :  { %2052 = vsyncpa [#allocation5 + $0x1], 1 }

</bundles_post_ra>
